<compile_context>
chip_gen: v7x
topology: tpu7x:2x2x1
jax: 0.10.0
libtpu: 0.0.40
codegen_flags: <defaults>
</compile_context>

<pallas_src>
import itertools
import functools
import math

import jax
import jax.numpy as jnp
from jax.experimental import pallas as pl
from jax.experimental.pallas import tpu as pltpu


def _bilinear_group_kernel(ii_ref, jj_ref, x_ref, w_ref, o_ref, *, tp):
    """One grid step: TP pairs for one batch tile.

    ii_ref / jj_ref : (P_pad,) int32 SMEM   -- scalar-prefetched pair field ids
    x_ref           : (F, b_tile, E) VMEM   -- resident across the pair-group axis
    w_ref           : (1, TP*E, TP*E) VMEM  -- block-diagonal pre-transposed weights
    o_ref           : (b_tile, TP*E) VMEM   -- lane-dense output slab
    """
    base = pl.program_id(1) * tp
    # Gather the TP left / right field embeddings into lane-dense slabs (TP is small
    # and static -> unrolled; pieces feed straight into the matmul / Hadamard).
    xl = jnp.concatenate([x_ref[ii_ref[base + t]] for t in range(tp)], axis=-1)
    xr = jnp.concatenate([x_ref[jj_ref[base + t]] for t in range(tp)], axis=-1)
    # Single MXU matmul per step: block-diagonal weights give
    #   y[:, t*E:(t+1)*E] = xl_t @ W_t.T   for every pair t of this group.
    y = jnp.dot(xl, w_ref[0], preferred_element_type=jnp.float32)
    o_ref[...] = (y * xr.astype(jnp.float32)).astype(o_ref.dtype)


def _vmem_limit_bytes():
    """Per-chip VMEM limit with headroom (96 MiB on v5e/v6e, 48 MiB on v7x)."""
    try:
        phys = int(pltpu.get_tpu_info().vmem_capacity_bytes)
    except Exception:
        phys = 64 * 1024 * 1024          # conservative (v7x physical VMEM)
    return min((phys * 3) // 4, 112 * 1024 * 1024)


def _pick_b_tile(batch, f, e, tp, vmem_limit):
    """Largest batch tile that fits the VMEM budget (partial edge blocks are masked)."""
    # f32 bytes resident per batch row: x block (double-buffered) + output block
    # (double-buffered) + ~3 slab-sized temporaries (xl, xr, y).
    per_row = 4 * (2 * f * e + 2 * tp * e + 3 * tp * e)
    budget = vmem_limit // 2             # headroom for weights + compiler scratch
    cap = max(8, min(4096, (budget // per_row) // 8 * 8))
    return batch if batch <= cap else cap


@functools.partial(jax.jit, static_argnames=("field_size",))
def bilinear_interaction(x, weights, field_size):
    """x: (B, F, E); weights: (P, E, E) in nn.Linear (out, in) layout. Returns (B, P, E)."""
    B, F, E = x.shape
    pairs = list(itertools.combinations(range(field_size), 2))
    P = len(pairs)
    assert F == field_size, (F, field_size)
    assert weights.shape == (P, E, E), (weights.shape, (P, E, E))

    # --- static tiling choices -------------------------------------------------
    tp = max(1, 128 // math.gcd(E, 128))          # pairs per step; tp*E % 128 == 0
    ng = -(-P // tp)                              # ceil(P / tp); last block masked
    p_pad = ng * tp
    vmem_limit = _vmem_limit_bytes()
    b_tile = _pick_b_tile(B, F, E, tp, vmem_limit)
    nb = -(-B // b_tile)                          # last batch block masked if partial

    # --- one-time wrapper-side layout plumbing ----------------------------------
    ii = jnp.array([p[0] for p in pairs] + [0] * (p_pad - P), dtype=jnp.int32)
    jj = jnp.array([p[1] for p in pairs] + [0] * (p_pad - P), dtype=jnp.int32)
    # field-major x; drop this transpose if the producer can emit (F, B, E) directly.
    x_fm = jnp.transpose(x, (1, 0, 2))            # (F, B, E)
    # pre-transpose weights once (y = xl @ W.T) and pack each group of tp pairs into a
    # block-diagonal (tp*E, tp*E) matrix; padded pairs get zero weights.
    w_t = jnp.transpose(weights, (0, 2, 1))       # (P, E, E)
    if p_pad > P:
        w_t = jnp.concatenate(
            [w_t, jnp.zeros((p_pad - P, E, E), dtype=w_t.dtype)], axis=0)
    w_grp = w_t.reshape(ng, tp, E, E)
    eye = jnp.eye(tp, dtype=w_t.dtype)
    w_bd = jnp.einsum("gtij,ts->gtisj", w_grp, eye).reshape(ng, tp * E, tp * E)

    kernel = functools.partial(_bilinear_group_kernel, tp=tp)

    out_flat = pl.pallas_call(
        kernel,
        out_shape=jax.ShapeDtypeStruct((B, P * E), x.dtype),
        grid_spec=pltpu.PrefetchScalarGridSpec(
            num_scalar_prefetch=2,                # ii, jj -> SMEM
            grid=(nb, ng),
            in_specs=[
                # whole x for this batch tile; index_map ignores the pair-group axis so
                # the block stays resident in VMEM across the inner pair-group loop.
                pl.BlockSpec((F, b_tile, E), lambda b, g, ii, jj: (0, b, 0)),
                # per-group block-diagonal weights (64 KiB for E=32).
                pl.BlockSpec((1, tp * E, tp * E), lambda b, g, ii, jj: (g, 0, 0)),
            ],
            # lane-dense (b_tile, tp*E) slab written straight into the flat (B, P*E)
            # output; the last (partial) column / batch blocks are masked by Pallas.
            out_specs=pl.BlockSpec((b_tile, tp * E), lambda b, g, ii, jj: (b, g)),
        ),
        compiler_params=pltpu.CompilerParams(
            # batch axis is megacore-shardable; keep the pair-group axis "arbitrary" so
            # both cores keep their x block resident instead of double-DMAing it.
            dimension_semantics=("parallel", "arbitrary"),
            vmem_limit_bytes=vmem_limit,
        ),
    )(ii, jj, x_fm, w_bd)

    # contiguous reshape only -- no slice, no copy of the dominant tensor.
    return out_flat.reshape(B, P, E)


def make_weights(field_size, embedding_size, key):
    """P = C(F,2) independent Linear(E, E, bias=False) weights, nn.Linear default init."""
    pairs = list(itertools.combinations(range(field_size), 2))
    P = len(pairs)
    bound = 1.0 / (embedding_size ** 0.5)
    return jax.random.uniform(
        key, (P, embedding_size, embedding_size),
        minval=-bound, maxval=bound, dtype=jnp.float32)


def reference(x, weights, field_size):
    pairs = list(itertools.combinations(range(field_size), 2))
    outs = []
    for p, (i, j) in enumerate(pairs):
        outs.append((x[:, i, :] @ weights[p].T) * x[:, j, :])
    return jnp.stack(outs, axis=1)                # (B, P, E)


if __name__ == "__main__":
    # small deterministic shapes: B=4, F=6 fields, E=32 -> P=15 pairs (tp=4, last block masked)
    B, F, E = 4, 6, 32
    key = jax.random.PRNGKey(0)
    kx, kw = jax.random.split(key)
    x = jax.random.normal(kx, (B, F, E), dtype=jnp.float32)
    weights = make_weights(F, E, kw)

    out = bilinear_interaction(x, weights, F)
    out = jax.block_until_ready(out)

    ref = reference(x, weights, F)
    P = F * (F - 1) // 2
    assert out.shape == (B, P, E), out.shape
    assert jnp.allclose(out, ref, atol=1e-5, rtol=1e-5), "mismatch vs reference"

    print("KERNEL_OK")
</pallas_src>

<mosaic_0001>
module attributes {stable_mosaic.version = 11 : i64} {
  func.func @_bilinear_group_kernel(%arg0: i32, %arg1: i32, %arg2: memref<16xi32, #tpu.memory_space<smem>>, %arg3: memref<16xi32, #tpu.memory_space<smem>>, %arg4: memref<6x4x32xf32, #tpu.memory_space<vmem>>, %arg5: memref<1x128x128xf32, #tpu.memory_space<vmem>>, %arg6: memref<4x128xf32, #tpu.memory_space<vmem>>) attributes {dimension_semantics = [#tpu.dimension_semantics<parallel>, #tpu.dimension_semantics<arbitrary>], iteration_bounds = array<i64: 1, 4>, scalar_prefetch = 2 : i64, scratch_operands = 0 : i64, tpu.core_type = #tpu.core_type<tc>, window_params = [{transform_indices = @transform_0, window_bounds = array<i64: 6, 4, 32>}, {transform_indices = @transform_1, window_bounds = array<i64: 1, 128, 128>}, {transform_indices = @transform_2, window_bounds = array<i64: 4, 128>}]} {
    %c4_i32 = arith.constant 4 : i32
    %0 = arith.muli %arg1, %c4_i32 : i32
    %c0_i32 = arith.constant 0 : i32
    %1 = arith.addi %0, %c0_i32 : i32
    %2 = arith.index_cast %1 : i32 to index
    %3 = memref.load %arg2[%2] : memref<16xi32, #tpu.memory_space<smem>>
    %4 = arith.index_cast %3 : i32 to index
    %c0 = arith.constant 0 : index
    %c0_0 = arith.constant 0 : index
    %5 = vector.load %arg4[%4, %c0, %c0_0] : memref<6x4x32xf32, #tpu.memory_space<vmem>>, vector<1x4x32xf32>
    %6 = vector.shape_cast %5 : vector<1x4x32xf32> to vector<4x32xf32>
    %c1_i32 = arith.constant 1 : i32
    %7 = arith.addi %0, %c1_i32 : i32
    %8 = arith.index_cast %7 : i32 to index
    %9 = memref.load %arg2[%8] : memref<16xi32, #tpu.memory_space<smem>>
    %10 = arith.index_cast %9 : i32 to index
    %c0_1 = arith.constant 0 : index
    %c0_2 = arith.constant 0 : index
    %11 = vector.load %arg4[%10, %c0_1, %c0_2] : memref<6x4x32xf32, #tpu.memory_space<vmem>>, vector<1x4x32xf32>
    %12 = vector.shape_cast %11 : vector<1x4x32xf32> to vector<4x32xf32>
    %c2_i32 = arith.constant 2 : i32
    %13 = arith.addi %0, %c2_i32 : i32
    %14 = arith.index_cast %13 : i32 to index
    %15 = memref.load %arg2[%14] : memref<16xi32, #tpu.memory_space<smem>>
    %16 = arith.index_cast %15 : i32 to index
    %c0_3 = arith.constant 0 : index
    %c0_4 = arith.constant 0 : index
    %17 = vector.load %arg4[%16, %c0_3, %c0_4] : memref<6x4x32xf32, #tpu.memory_space<vmem>>, vector<1x4x32xf32>
    %18 = vector.shape_cast %17 : vector<1x4x32xf32> to vector<4x32xf32>
    %c3_i32 = arith.constant 3 : i32
    %19 = arith.addi %0, %c3_i32 : i32
    %20 = arith.index_cast %19 : i32 to index
    %21 = memref.load %arg2[%20] : memref<16xi32, #tpu.memory_space<smem>>
    %22 = arith.index_cast %21 : i32 to index
    %c0_5 = arith.constant 0 : index
    %c0_6 = arith.constant 0 : index
    %23 = vector.load %arg4[%22, %c0_5, %c0_6] : memref<6x4x32xf32, #tpu.memory_space<vmem>>, vector<1x4x32xf32>
    %24 = vector.shape_cast %23 : vector<1x4x32xf32> to vector<4x32xf32>
    %25 = tpu.concatenate %6, %12, %18, %24 in 1 : vector<4x32xf32>, vector<4x32xf32>, vector<4x32xf32>, vector<4x32xf32> -> vector<4x128xf32>
    %c0_i32_7 = arith.constant 0 : i32
    %26 = arith.addi %0, %c0_i32_7 : i32
    %27 = arith.index_cast %26 : i32 to index
    %28 = memref.load %arg3[%27] : memref<16xi32, #tpu.memory_space<smem>>
    %29 = arith.index_cast %28 : i32 to index
    %c0_8 = arith.constant 0 : index
    %c0_9 = arith.constant 0 : index
    %30 = vector.load %arg4[%29, %c0_8, %c0_9] : memref<6x4x32xf32, #tpu.memory_space<vmem>>, vector<1x4x32xf32>
    %31 = vector.shape_cast %30 : vector<1x4x32xf32> to vector<4x32xf32>
    %c1_i32_10 = arith.constant 1 : i32
    %32 = arith.addi %0, %c1_i32_10 : i32
    %33 = arith.index_cast %32 : i32 to index
    %34 = memref.load %arg3[%33] : memref<16xi32, #tpu.memory_space<smem>>
    %35 = arith.index_cast %34 : i32 to index
    %c0_11 = arith.constant 0 : index
    %c0_12 = arith.constant 0 : index
    %36 = vector.load %arg4[%35, %c0_11, %c0_12] : memref<6x4x32xf32, #tpu.memory_space<vmem>>, vector<1x4x32xf32>
    %37 = vector.shape_cast %36 : vector<1x4x32xf32> to vector<4x32xf32>
    %c2_i32_13 = arith.constant 2 : i32
    %38 = arith.addi %0, %c2_i32_13 : i32
    %39 = arith.index_cast %38 : i32 to index
    %40 = memref.load %arg3[%39] : memref<16xi32, #tpu.memory_space<smem>>
    %41 = arith.index_cast %40 : i32 to index
    %c0_14 = arith.constant 0 : index
    %c0_15 = arith.constant 0 : index
    %42 = vector.load %arg4[%41, %c0_14, %c0_15] : memref<6x4x32xf32, #tpu.memory_space<vmem>>, vector<1x4x32xf32>
    %43 = vector.shape_cast %42 : vector<1x4x32xf32> to vector<4x32xf32>
    %c3_i32_16 = arith.constant 3 : i32
    %44 = arith.addi %0, %c3_i32_16 : i32
    %45 = arith.index_cast %44 : i32 to index
    %46 = memref.load %arg3[%45] : memref<16xi32, #tpu.memory_space<smem>>
    %47 = arith.index_cast %46 : i32 to index
    %c0_17 = arith.constant 0 : index
    %c0_18 = arith.constant 0 : index
    %48 = vector.load %arg4[%47, %c0_17, %c0_18] : memref<6x4x32xf32, #tpu.memory_space<vmem>>, vector<1x4x32xf32>
    %49 = vector.shape_cast %48 : vector<1x4x32xf32> to vector<4x32xf32>
    %50 = tpu.concatenate %31, %37, %43, %49 in 1 : vector<4x32xf32>, vector<4x32xf32>, vector<4x32xf32>, vector<4x32xf32> -> vector<4x128xf32>
    %c0_19 = arith.constant 0 : index
    %c0_20 = arith.constant 0 : index
    %c0_21 = arith.constant 0 : index
    %51 = vector.load %arg5[%c0_19, %c0_20, %c0_21] : memref<1x128x128xf32, #tpu.memory_space<vmem>>, vector<1x128x128xf32>
    %52 = vector.shape_cast %51 : vector<1x128x128xf32> to vector<128x128xf32>
    %cst = arith.constant dense<0.000000e+00> : vector<4x128xf32>
    %53 = tpu.matmul %25, %52, %cst {dimension_numbers = #tpu.dot_dimension_numbers<[1], [0], [0], [1], [0, 0, 1, 1], [], []>} : vector<4x128xf32>, vector<128x128xf32>, vector<4x128xf32> -> vector<4x128xf32>
    %54 = arith.mulf %53, %50 : vector<4x128xf32>
    %c0_22 = arith.constant 0 : index
    %c0_23 = arith.constant 0 : index
    %55 = vector.load %arg6[%c0_22, %c0_23] : memref<4x128xf32, #tpu.memory_space<vmem>>, vector<4x128xf32>
    tpu.vector_store %arg6[%c0_22, %c0_23], %54 {strides = array<i32>} : memref<4x128xf32, #tpu.memory_space<vmem>>, vector<4x128xf32>,
    return
  }
  func.func @transform_0(%arg0: i32, %arg1: i32, %arg2: memref<16xi32, #tpu.memory_space<smem>>, %arg3: memref<16xi32, #tpu.memory_space<smem>>) -> (i32, i32, i32) {
    %c0_i32 = arith.constant 0 : i32
    %c0_i32_0 = arith.constant 0 : i32
    %c0_i32_1 = arith.constant 0 : i32
    return %c0_i32, %arg0, %c0_i32_0 : i32, i32, i32
  }
  func.func @transform_1(%arg0: i32, %arg1: i32, %arg2: memref<16xi32, #tpu.memory_space<smem>>, %arg3: memref<16xi32, #tpu.memory_space<smem>>) -> (i32, i32, i32) {
    %c0_i32 = arith.constant 0 : i32
    %c0_i32_0 = arith.constant 0 : i32
    %c0_i32_1 = arith.constant 0 : i32
    return %arg1, %c0_i32, %c0_i32_0 : i32, i32, i32
  }
  func.func @transform_2(%arg0: i32, %arg1: i32, %arg2: memref<16xi32, #tpu.memory_space<smem>>, %arg3: memref<16xi32, #tpu.memory_space<smem>>) -> (i32, i32) {
    %c0_i32 = arith.constant 0 : i32
    return %arg0, %arg1 : i32, i32
  }
}

</mosaic_0001>

<bundles_post_ra>
// kernel: bilinear_interaction.1
= control target key start
LH: loop header
LB: loop body
LE: loop exit
PB: predicated region body
PF: predicated region fallthrough
CT: control target
= control target key end

     0   :  { %s781_s0 = inlined_call_operand.vmem [shape: s32[16], index: 0, kind: input, shape index: {}]   ;;  %s782_s2 = inlined_call_operand.vmem [shape: f32[6,4,32], index: 2, kind: input, shape index: {}]   ;;  %s783_s3 = inlined_call_operand.vmem [shape: f32[4,128,128], index: 3, kind: input, shape index: {}]   ;;  %s784_s4 = inlined_call_operand.vmem [shape: f32[4,480], index: 4, kind: output, shape index: {}]   ;;  %s785_s1 = inlined_call_operand.vmem [shape: s32[16], index: 1, kind: input, shape index: {}]  }
   0x1   :  { %s9_s17 = sshll.u32 %s781_s0, 4  ;;  %s13_s20 = sshll.u32 %s785_s1, 4  ;;  %s10_s17 = int_to_ptr.vmem [resolvable:$true] %s9_s17  ;;  %s14_s20 = int_to_ptr.vmem [resolvable:$true] %s13_s20 }
   0x2   :  { %s588_s21 = scalar_lea.vmem %s10_s17, 16  ;;  %p593_p1 = scmp.lt.s32.totalorder %s10_s17, %s10_s17 }
   0x3   :  { %p589_p0 = scmp.ne.s32.totalorder %s10_s17, %s588_s21  ;;  %p594_p2 = scmp.lt.s32.totalorder %s588_s21, %s588_s21 }
   0x5   :  { %p595_p3 = por %p594_p2, %p593_p1 }
   0x7   :  { %p596_p4 = pnand %p595_p3, %p589_p0 }
   0x9   :  { %599 = shalt.err (!%p596_p4)  }
   0xa   :  { %s638_s22 = smov [#allocation3]   ;;  %s600_s23 = scalar_lea.vmem %s14_s20, 16 }
   0xb   :  { %12 = dma.vmem_to_smem %s10_s17, 16, %s638_s22, [#allocation2] }
   0xc   :  { %p601_p5 = scmp.ne.s32.totalorder %s14_s20, %s600_s23  ;;  %p605_p6 = scmp.lt.s32.totalorder %s14_s20, %s14_s20 }
   0xd   :  { %p606_p7 = scmp.lt.s32.totalorder %s600_s23, %s600_s23 }
   0xf   :  { %p607_p8 = por %p606_p7, %p605_p6 }
  0x11   :  { %p608_p9 = pnand %p607_p8, %p601_p5 }
  0x13   :  { %611 = shalt.err (!%p608_p9)  }
  0x14   :  { %s639_s0 = smov [#allocation4]  }
  0x15   :  { %16 = dma.vmem_to_smem %s14_s20, 16, %s639_s0, [#allocation2] }
  0x16   :  { %624 = dma.done.wait [#allocation2], 32 }
  0x17   :  { %625 = vsyncadd [#allocation2], 4294967264 }
  0x18   :  { %18 = sfence }
  0x19   :  { %s677_s1 = smov 0   ;;  %s679_s24 = smov 0  }
  0x1a   :  { %s681_s25 = smov 0  }
  0x1b LB: > { %s33_s26 = sadd.s32 1, %s632_s24  ;;  %p464_p10 = scmp.ge.s32.totalorder %s636_s25, 1  ;;  %s636_s25 = sphi %s681_s25, %s24_s25   ;;  %s632_s24 = sphi %s679_s24, %s787_s24   ;;  %s628_s1 = sphi %s677_s1, %s786_s1  }
  0x1c   : > { %p34_p11 = scmp.ge.s32.totalorder %s33_s26, 4  ;;  %p147_p12 = scmp.lt.s32.totalorder %s636_s25, 5 }
  0x1e   : > { %s789_s26 = smov (%p34_p11, %s33_s26), 0  ;;  %p148_p13 = pnand %p464_p10, %p147_p12 }
  0x1f   : > { %s695_s27 = sshll.u32 (!%p148_p13), %s628_s1, 2  ;;  %v640_v0 = vmov (!%p148_p13), 0.0|0.0   ;;  %vm641_vm0 = vmmov (!%p148_p13), 0   ;;  %v642_v1 = vmov (!%p148_p13), 0.0   ;;  %p180_p0 = scmp.lt.s32.totalorder (!%p148_p13), %s628_s1, 3  ;;  %vm225_vm1 = vcmask (!%p148_p13), 261120  }
  0x20   : > { %151 = sbr.rel (%p148_p13) target bundleno = 378 (0x17a), region = 28  ;;  %s198_s28 = sadd.s32 (!%p148_p13), 1, %s695_s27  ;;  %532 = vmatprep.subr.bf16.mxu0 (!%p148_p13), %v640_v0  ;;  %529 = vmatprep.mubr.msk.f32.mxu0 (!%p148_p13), %vm641_vm0, %v642_v1  ;;  %vm227_vm2 = vcmask (!%p148_p13), 523264   ;;  %vm229_vm3 = vcmask (!%p148_p13), 785408  }
  0x21   : > { %s203_s29 = sadd.s32 (!%p148_p13), 2, %s695_s27  ;;  %s199_s30 = sld [smem:[#allocation3 + %s198_s28]] (!%p148_p13) }
  0x22   : > { %s204_s5 = sld [smem:[#allocation3 + %s203_s29]] (!%p148_p13)  ;;  %s208_s6 = sadd.s32 (!%p148_p13), 3, %s695_s27 }
  0x23   : > { %s209_s7 = sld [smem:[#allocation3 + %s208_s6]] (!%p148_p13)  ;;  %s643_s20 = smov (!%p148_p13), 32  }
  0x24   : > { %s703_s8 = sld [smem:[#allocation4 + %s198_s28]] (!%p148_p13) }
  0x25   : > { %s705_s9 = sld [smem:[#allocation4 + %s203_s29]] (!%p148_p13) }
  0x27   : > { %s791_s1 = smov (!%p180_p0, %s628_s1), 3  ;;  %s470_s10 = sshll.u32 %s199_s30, 2 }
  0x28   : > { %s471_s11 = sshll.u32 %s204_s5, 2  ;;  %s201_s14 = scalar_lea.vmem %s782_s2, %s470_s10 }
  0x29   : > { %s206_s17 = scalar_lea.vmem %s782_s2, %s471_s11  ;;  %v202_v2 = vld [vmem:[%s201_s14] sm:$0xf]  ;;  %s472_s18 = sshll.u32 %s209_s7, 2 }
  0x2a   : > { %s479_s19 = sshll.u32 %s791_s1, 7  ;;  %214 = vrot.lane.b32.xlu0 %v202_v2, %s643_s20  ;;  %v207_v3 = vld [vmem:[%s206_s17] sm:$0xf]  ;;  %s211_s23 = scalar_lea.vmem %s782_s2, %s472_s18 }
  0x2b   : > { %s722_s29 = scalar_lea.vmem %s783_s3, %s479_s19  ;;  %v212_v4 = vld [vmem:[%s211_s23] sm:$0xf]  ;;  %s474_s30 = sshll.u32 %s703_s8, 2 }
  0x2c   : > { %v262_v5 = vld [vmem:[%s722_s29] sm:$0xff]  ;;  %v263_v6 = vld [vmem:[%s722_s29 + $0x8] sm:$0xff]  ;;  %s644_s5 = smov 96   ;;  %v264_v8 = vld [vmem:[%s722_s29 + $0x10] sm:$0xff]  ;;  %s475_s7 = sshll.u32 %s705_s9, 2 }
  0x2d   : > { %222 = vrot.lane.b32.xlu1 %v212_v4, %s644_s5  ;;  %v533_v7 = vpack.c.bf16 %v263_v6, %v262_v5  ;;  %v265_v9 = vld [vmem:[%s722_s29 + $0x18] sm:$0xff]  ;;  %s243_s10 = sld [smem:[#allocation4 + %s208_s6]]  ;;  %s645_s11 = smov 64   ;;  %v266_v11 = vld [vmem:[%s722_s29 + $0x20] sm:$0xff]  ;;  %v267_v12 = vld [vmem:[%s722_s29 + $0x28] sm:$0xff] }
  0x2e   : > { %218 = vrot.lane.b32.xlu0 %v207_v3, %s645_s11  ;;  %v536_v10 = vpack.c.bf16 %v265_v9, %v264_v8  ;;  %s237_s14 = scalar_lea.vmem %s782_s2, %s474_s30  ;;  %s241_s16 = scalar_lea.vmem %s782_s2, %s475_s7  ;;  %v539_v15 = vpack.c.bf16 %v267_v12, %v266_v11  ;;  %v268_v16 = vld [vmem:[%s722_s29 + $0x30] sm:$0xff]  ;;  %v269_v17 = vld [vmem:[%s722_s29 + $0x38] sm:$0xff]  ;;  %v270_v20 = vld [vmem:[%s722_s29 + $0x40] sm:$0xff] }
  0x2f   : > { %534 = vmatpush3.bf16.msra.mxu0 %v533_v7  ;;  %v238_v13 = vld [vmem:[%s237_s14] sm:$0xf]  ;;  %v542_v19 = vpack.c.bf16 %v269_v17, %v268_v16  ;;  %v271_v21 = vld [vmem:[%s722_s29 + $0x48] sm:$0xff]  ;;  %v272_v23 = vld [vmem:[%s722_s29 + $0x50] sm:$0xff]  ;;  %s194_s19 = sld [smem:[#allocation3 + %s695_s27]] }
  0x30   : > { %535 = vmatprep.subr.bf16.mxu0 %v640_v0  ;;  %v242_v14 = vld [vmem:[%s241_s16] sm:$0xf]  ;;  %v545_v22 = vpack.c.bf16 %v271_v21, %v270_v20  ;;  %v273_v24 = vld [vmem:[%s722_s29 + $0x58] sm:$0xff]  ;;  %v275_v27 = vld [vmem:[%s722_s29 + $0x68] sm:$0xff] }
  0x31   : > { %248 = vrot.lane.b32.xlu1 %v238_v13, %s643_s20  ;;  %v548_v25 = vpack.c.bf16 %v273_v24, %v272_v23  ;;  %v274_v26 = vld [vmem:[%s722_s29 + $0x60] sm:$0xff]  ;;  %v276_v29 = vld [vmem:[%s722_s29 + $0x70] sm:$0xff]  ;;  %v277_v30 = vld [vmem:[%s722_s29 + $0x78] sm:$0xff]  ;;  %s231_s20 = sld [smem:[#allocation4 + %s695_s27]]  ;;  %s467_s27 = sshll.u32 %s791_s1, 2 }
  0x32   : > { %252 = vrot.lane.b32.xlu0 %v242_v14, %s645_s11  ;;  %v551_v28 = vpack.c.bf16 %v275_v27, %v274_v26  ;;  %v554_v31 = vpack.c.bf16 %v277_v30, %v276_v29  ;;  %s192_s11 = scalar_lea.vmem %s784_s4, %s467_s27 }
  0x33   : > { %537 = vmatpush3.bf16.msra.mxu0 %v536_v10  ;;  %s476_s6 = sshll.u32 %s243_s10, 2 }
  0x34   : > { %538 = vmatprep.subr.bf16.mxu0 %v640_v0  ;;  %s245_s18 = scalar_lea.vmem %s782_s2, %s476_s6 }
  0x35   : > { %v246_v18 = vld [vmem:[%s245_s18] sm:$0xf]  ;;  %s469_s21 = sshll.u32 %s194_s19, 2 }
  0x36   : > { %256 = vrot.lane.b32.xlu1 %v246_v18, %s644_s5  ;;  %s196_s0 = scalar_lea.vmem %s782_s2, %s469_s21 }
  0x37   : > { %540 = vmatpush3.bf16.msra.mxu0 %v539_v15  ;;  %s473_s28 = sshll.u32 %s231_s20, 2  ;;  %v197_v33 = vld [vmem:[%s196_s0] sm:$0xf] }
  0x38   : > { %541 = vmatprep.subr.bf16.mxu0 %v640_v0  ;;  %s233_s5 = scalar_lea.vmem %s782_s2, %s473_s28 }
  0x39   : > { %v234_v39 = vld [vmem:[%s233_s5] sm:$0xf] }
  0x3b   : > { %543 = vmatpush3.bf16.msra.mxu0 %v542_v19 }
  0x3c   : > { %544 = vmatprep.subr.bf16.mxu0 %v640_v0 }
  0x3f   : > { %546 = vmatpush3.bf16.msra.mxu0 %v545_v22 }
  0x40   : > { %547 = vmatprep.subr.bf16.mxu0 %v640_v0 }
  0x43   : > { %549 = vmatpush3.bf16.msra.mxu0 %v548_v25 }
  0x44   : > { %550 = vmatprep.subr.bf16.mxu0 %v640_v0 }
  0x47   : > { %552 = vmatpush3.bf16.msra.mxu0 %v551_v28 }
  0x48   : > { %553 = vmatprep.subr.bf16.mxu0 %v640_v0 }
  0x4b   : > { %555 = vmatpush3.bf16.msra.mxu0 %v554_v31 }
  0x9c   : > { %v215_v32 = vpop.permute.xlu0 %214 }
  0x9d   : > { %v226_v35 = vsel %vm225_vm1, %v197_v33, %v215_v32 }
  0x9f   : > { %v223_v34 = vpop.permute.xlu1 %222 }
  0xa0   : > { %v219_v36 = vpop.permute.xlu0 %218 }
  0xa1   : > { %v228_v37 = vsel %vm227_vm2, %v226_v35, %v219_v36 }
  0xa2   : > { %v230_v38 = vsel %vm229_vm3, %v228_v37, %v223_v34 }
  0xa3   : > { %530 = vmatmul.mubr.f32.vlgmr.msra.gmra.mrb[0].mxu0 %v230_v38  ;;  %v249_v40 = vpop.permute.xlu1 %248 }
  0xa4   : > { %v259_v41 = vsel %vm225_vm1, %v234_v39, %v249_v40  ;;  %v253_v42 = vpop.permute.xlu0 %252 }
  0xa5   : > { %v260_v43 = vsel %vm227_vm2, %v259_v41, %v253_v42 }
  0xa8   : > { %v257_v44 = vpop.permute.xlu1 %256 }
  0xa9   : > { %v261_v45 = vsel %vm229_vm3, %v260_v43, %v257_v44 }
 0x176   : > { %v344_v46 = vpop.f32.mrb[0].mxu0 }
 0x177   : > { %v348_v47 = vmul.f32 %v344_v46, %v261_v45  ;;  %v531_v48 = vpop.f32.mrb[1].mxu0 }
 0x179   : > { %349 = vst [vmem:[%s192_s11] sm:$0xf] %v348_v47 }
 0x17a PF: > { %s24_s25 = sadd.s32 1, %s636_s25   ;;  %s786_s1 = smov %s632_s24 }
 0x17b   : > { %p21_p1 = scmp.ge.s32.totalorder %s24_s25, 6   ;;  %s787_s24 = smov %s789_s26 }
 0x17d   :  { %23 = sbr.rel (!%p21_p1) target bundleno = 27 (0x1b), region = 69 }

</bundles_post_ra>
